<compile_context>
chip_gen: v6e
topology: v6e:2x2x1
jax: 0.10.0
libtpu: 0.0.40
codegen_flags: <defaults>
</compile_context>

<pallas_src>
import math
from functools import partial

import numpy as np
import jax
import jax.numpy as jnp
from jax.experimental import pallas as pl
from jax.experimental.pallas import tpu as pltpu


# ----------------------------------------------------------------------------
# Generation-aware VMEM budget.
# ----------------------------------------------------------------------------
_VMEM_LIMIT_CACHE = None


def _vmem_limit_bytes():
    """Scoped-VMEM budget: ~3/4 of physical VMEM, capped at 110 MiB.
    v5e/v6e (128 MiB) -> ~96 MiB, v7x (64 MiB) -> 48 MiB.  Falls back to a
    universally-safe 48 MiB if the hardware query is unavailable."""
    global _VMEM_LIMIT_CACHE
    if _VMEM_LIMIT_CACHE is None:
        limit = 48 * 1024 * 1024
        try:
            cap = getattr(pltpu.get_tpu_info(), "vmem_capacity_bytes", None)
            if cap:
                limit = min(int(cap) * 3 // 4, 110 * 1024 * 1024)
        except Exception:
            pass
        _VMEM_LIMIT_CACHE = int(limit)
    return _VMEM_LIMIT_CACHE


# ----------------------------------------------------------------------------
# Shape / tiling helpers.
# ----------------------------------------------------------------------------
def _round_up(v, m):
    return ((v + m - 1) // m) * m


def _largest_divisor(n, cap, multiple):
    """Largest divisor of `n` that is a multiple of `multiple` and <= cap.
    Assumes `multiple` divides `n`."""
    d = min(cap, n)
    d -= d % multiple
    while d > multiple:
        if n % d == 0:
            return d
        d -= multiple
    return multiple


def _pad_cast(a, rpad, cpad, compute_dtype):
    """Zero-pad (exact: padded rows/cols contribute 0).  If a padded copy has
    to be made anyway, fold the compute-dtype cast into that single copy;
    otherwise leave the array untouched in HBM (the kernels cast tiles after
    the DMA), so no extra full-size HBM copy of the dominant operand."""
    if rpad or cpad:
        a = jnp.pad(a, ((0, rpad), (0, cpad)))
        if a.dtype != compute_dtype:
            a = a.astype(compute_dtype)
    return a


def _choose_tiles(m, k, n, a_isz, b_isz, o_isz, vmem_budget):
    """(tm, tn, tk) for an [m,k]@[k,n] matmul.  tn = full padded N (<=1024) so
    the A operand is fetched exactly once per row block; tm up to 512 rows;
    tk = the whole contraction when the A/B strips fit the VMEM budget
    (single-K kernel, no accumulator), else the largest fitting divisor."""
    tn = _largest_divisor(n, 1024, 128)
    tm = _largest_divisor(m, 512, 8)

    def need(tm_, tn_, tk_):
        # 2x double-buffered input tiles + 2x output tile + f32 accumulator
        # + in-kernel compute-dtype copies of the two input tiles.
        return (2 * (tm_ * tk_ * a_isz + tk_ * tn_ * b_isz)
                + 2 * tm_ * tn_ * o_isz + tm_ * tn_ * 4
                + tm_ * tk_ * 2 + tk_ * tn_ * 2)

    if need(tm, tn, k) <= vmem_budget:
        return tm, tn, k
    tk = _largest_divisor(k, 2048, 128)
    while tk > 128 and need(tm, tn, tk) > vmem_budget:
        tk = _largest_divisor(k, tk - 128, 128)
    while tm > 8 and need(tm, tn, tk) > vmem_budget:
        tm = _largest_divisor(m, max(tm // 2, 8), 8)
    while tn > 128 and need(tm, tn, tk) > vmem_budget:
        tn = _largest_divisor(n, max(tn // 2, 128), 128)
    return tm, tn, tk


# ----------------------------------------------------------------------------
# Kernels.  Operands are cast to the MXU compute dtype AFTER the DMA (a no-op
# if they already arrive in that dtype); accumulation is always float32 and
# all elementwise work (bias add, final cast) stays f32 (v5e has no bf16 VPU).
# ----------------------------------------------------------------------------
def _matmul_kernel_1k(compute_dtype, a_ref, b_ref, o_ref):
    # Whole contraction in one MXU call: no accumulator scratch, no branches.
    o_ref[...] = jnp.dot(a_ref[...].astype(compute_dtype),
                         b_ref[...].astype(compute_dtype),
                         preferred_element_type=jnp.float32).astype(o_ref.dtype)


def _matmul_bias_kernel_1k(compute_dtype, a_ref, b_ref, bias_ref, o_ref):
    acc = jnp.dot(a_ref[...].astype(compute_dtype),
                  b_ref[...].astype(compute_dtype),
                  preferred_element_type=jnp.float32)
    o_ref[...] = (acc + bias_ref[...]).astype(o_ref.dtype)


def _matmul_kernel(compute_dtype, a_ref, b_ref, o_ref, acc_ref):
    @pl.when(pl.program_id(2) == 0)
    def _init():
        acc_ref[...] = jnp.zeros_like(acc_ref)

    acc_ref[...] += jnp.dot(a_ref[...].astype(compute_dtype),
                            b_ref[...].astype(compute_dtype),
                            preferred_element_type=jnp.float32)

    @pl.when(pl.program_id(2) == pl.num_programs(2) - 1)
    def _finalize():
        o_ref[...] = acc_ref[...].astype(o_ref.dtype)


def _matmul_bias_kernel(compute_dtype, a_ref, b_ref, bias_ref, o_ref, acc_ref):
    @pl.when(pl.program_id(2) == 0)
    def _init():
        acc_ref[...] = jnp.zeros_like(acc_ref)

    acc_ref[...] += jnp.dot(a_ref[...].astype(compute_dtype),
                            b_ref[...].astype(compute_dtype),
                            preferred_element_type=jnp.float32)

    @pl.when(pl.program_id(2) == pl.num_programs(2) - 1)
    def _finalize():
        # Bias folded into the finalize branch only (not per reduction step).
        o_ref[...] = (acc_ref[...] + bias_ref[...]).astype(o_ref.dtype)


def _fused_gcn_kernel(compute_dtype, has_bias, *refs):
    """Whole GCN layer in one kernel body: support = x@W never leaves VMEM."""
    if has_bias:
        x_ref, w_ref, adj_ref, bias_ref, o_ref = refs
    else:
        x_ref, w_ref, adj_ref, o_ref = refs
        bias_ref = None
    support = jnp.dot(x_ref[...].astype(compute_dtype),
                      w_ref[...].astype(compute_dtype),
                      preferred_element_type=jnp.float32)
    out = jnp.dot(adj_ref[...].astype(compute_dtype),
                  support.astype(compute_dtype),
                  preferred_element_type=jnp.float32)
    if bias_ref is not None:
        out = out + bias_ref[...]
    o_ref[...] = out.astype(o_ref.dtype)


# ----------------------------------------------------------------------------
# pallas_call wrappers.
# ----------------------------------------------------------------------------
def _tiled_matmul(a, b, *, tm, tn, tk, compute_dtype, out_dtype, bias=None,
                  vmem_limit):
    """C = A @ B (+ bias).  Single-K 2D grid when tk == K, else (M, N, K) grid
    with K streamed last into a resident f32 accumulator."""
    m, k = a.shape
    k2, n = b.shape
    assert k == k2 and m % tm == 0 and n % tn == 0 and k % tk == 0
    nk = k // tk
    gi, gj = m // tm, n // tn

    out_bytes = m * n * jnp.dtype(out_dtype).itemsize
    bytes_accessed = (m * k * a.dtype.itemsize * gj
                      + k * n * b.dtype.itemsize * gi
                      + out_bytes)
    if bias is not None:
        bytes_accessed += n * 4 * gi
    cost = pl.CostEstimate(flops=int(2 * m * n * k), transcendentals=0,
                           bytes_accessed=int(bytes_accessed))

    # TODO(synk): optionally deepen adj prefetch with pl.Buffered(3) on v5e
    # (needs a runtime chip-generation check); default double-buffering here.
    if nk == 1:
        grid = (gi, gj)
        in_specs = [pl.BlockSpec((tm, k), lambda i, j: (i, 0)),
                    pl.BlockSpec((k, tn), lambda i, j: (0, j))]
        operands = [a, b]
        if bias is None:
            kernel = partial(_matmul_kernel_1k, compute_dtype)
        else:
            in_specs.append(pl.BlockSpec((1, tn), lambda i, j: (0, j)))
            operands.append(bias)
            kernel = partial(_matmul_bias_kernel_1k, compute_dtype)
        out_specs = pl.BlockSpec((tm, tn), lambda i, j: (i, j))
        scratch = []
        dims = ("parallel", "parallel")
    else:
        grid = (gi, gj, nk)
        in_specs = [pl.BlockSpec((tm, tk), lambda i, j, l: (i, l)),
                    pl.BlockSpec((tk, tn), lambda i, j, l: (l, j))]
        operands = [a, b]
        if bias is None:
            kernel = partial(_matmul_kernel, compute_dtype)
        else:
            in_specs.append(pl.BlockSpec((1, tn), lambda i, j, l: (0, j)))
            operands.append(bias)
            kernel = partial(_matmul_bias_kernel, compute_dtype)
        out_specs = pl.BlockSpec((tm, tn), lambda i, j, l: (i, j))
        scratch = [pltpu.VMEM((tm, tn), jnp.float32)]
        dims = ("parallel", "parallel", "arbitrary")

    return pl.pallas_call(
        kernel,
        out_shape=jax.ShapeDtypeStruct((m, n), out_dtype),
        grid_spec=pltpu.PrefetchScalarGridSpec(
            num_scalar_prefetch=0,
            grid=grid,
            in_specs=in_specs,
            out_specs=out_specs,
            scratch_shapes=scratch,
        ),
        compiler_params=pltpu.CompilerParams(
            dimension_semantics=dims,
            vmem_limit_bytes=int(vmem_limit)),
        cost_estimate=cost,
    )(*operands)


def _fused_vmem_estimate(x_p, w_p, adj_p, bias_p, f_out_pad, out_isz):
    n_pad = x_p.shape[0]
    est = 2 * (x_p.size * x_p.dtype.itemsize
               + w_p.size * w_p.dtype.itemsize
               + adj_p.size * adj_p.dtype.itemsize
               + n_pad * f_out_pad * out_isz)
    if bias_p is not None:
        est += 2 * bias_p.size * 4
    # In-kernel temporaries: compute-dtype copies of operands (worst case
    # 2 B/elem) plus the f32 support and f32 pre-cast output.
    est += (x_p.size + w_p.size + adj_p.size + n_pad * f_out_pad) * 2
    est += 2 * n_pad * f_out_pad * 4
    return est


def _fused_gcn(x_p, w_p, adj_p, bias_p, out_dtype, compute_dtype, vmem_limit):
    n_pad, f_in_pad = x_p.shape
    f_out_pad = w_p.shape[1]
    has_bias = bias_p is not None

    operands = [x_p, w_p, adj_p]
    in_specs = [
        pl.BlockSpec((n_pad, f_in_pad), lambda i: (0, 0)),
        pl.BlockSpec((f_in_pad, f_out_pad), lambda i: (0, 0)),
        pl.BlockSpec((n_pad, n_pad), lambda i: (0, 0)),
    ]
    if has_bias:
        operands.append(bias_p)
        in_specs.append(pl.BlockSpec((1, f_out_pad), lambda i: (0, 0)))

    out_isz = jnp.dtype(out_dtype).itemsize
    flops = 2 * n_pad * f_in_pad * f_out_pad + 2 * n_pad * n_pad * f_out_pad
    bytes_accessed = (sum(int(o.size) * o.dtype.itemsize for o in operands)
                      + n_pad * f_out_pad * out_isz)

    return pl.pallas_call(
        partial(_fused_gcn_kernel, compute_dtype, has_bias),
        out_shape=jax.ShapeDtypeStruct((n_pad, f_out_pad), out_dtype),
        grid_spec=pltpu.PrefetchScalarGridSpec(
            num_scalar_prefetch=0,
            grid=(1,),
            in_specs=in_specs,
            out_specs=pl.BlockSpec((n_pad, f_out_pad), lambda i: (0, 0)),
            scratch_shapes=[],
        ),
        compiler_params=pltpu.CompilerParams(
            dimension_semantics=("arbitrary",),
            vmem_limit_bytes=int(vmem_limit)),
        cost_estimate=pl.CostEstimate(flops=int(flops), transcendentals=0,
                                      bytes_accessed=int(bytes_accessed)),
    )(*operands)


# ----------------------------------------------------------------------------
# Public wrapper: GCN layer forward.
# ----------------------------------------------------------------------------
@partial(jax.jit, static_argnames=("compute_dtype",))
def graph_convolution(x, adj, weight, bias=None, *, compute_dtype=jnp.bfloat16):
    """Pallas-backed GCN layer: adj @ (x @ weight) (+ bias).

    x:      [N, F_in]
    adj:    [N, N]
    weight: [F_in, F_out]
    bias:   None or [1, 1, F_out]
    compute_dtype: dtype fed to the MXU (default bfloat16 on all TPU
        generations per perf review).  Accumulation, the bias add and the
        final cast are always float32.  Use jnp.float32 for full precision.
    """
    n, f_in = x.shape
    f_out = weight.shape[1]
    out_dtype = x.dtype
    cdt = jnp.dtype(compute_dtype)
    out_isz = jnp.dtype(out_dtype).itemsize

    # Lane-dense padding: only to the next multiple of 128 (no 512 rounding).
    n_pad = _round_up(n, 128)
    f_in_pad = _round_up(f_in, 128)
    f_out_pad = _round_up(f_out, 128)

    x_p = _pad_cast(x, n_pad - n, f_in_pad - f_in, cdt)
    w_p = _pad_cast(weight, f_in_pad - f_in, f_out_pad - f_out, cdt)
    adj_p = _pad_cast(adj, n_pad - n, n_pad - n, cdt)

    bias_p = None
    if bias is not None:
        bias_p = bias.reshape(1, f_out).astype(jnp.float32)
        if f_out_pad != f_out:
            bias_p = jnp.pad(bias_p, ((0, 0), (0, f_out_pad - f_out)))

    vmem_limit = _vmem_limit_bytes()

    use_fused = (
        n_pad <= 1024 and f_out_pad <= 512 and f_in_pad <= 4096
        and _fused_vmem_estimate(x_p, w_p, adj_p, bias_p, f_out_pad,
                                 out_isz) <= vmem_limit // 2)

    if use_fused:
        out_p = _fused_gcn(x_p, w_p, adj_p, bias_p, out_dtype, cdt, vmem_limit)
    else:
        budget = (vmem_limit * 3) // 4
        # Pass 1: support = x @ weight, computed once, stored in compute dtype.
        tm1, tn1, tk1 = _choose_tiles(n_pad, f_in_pad, f_out_pad,
                                      x_p.dtype.itemsize, w_p.dtype.itemsize,
                                      cdt.itemsize, budget)
        support = _tiled_matmul(x_p, w_p, tm=tm1, tn=tn1, tk=tk1,
                                compute_dtype=cdt, out_dtype=cdt,
                                vmem_limit=vmem_limit)
        # Pass 2: out = adj @ support (+ bias) -- the HBM-bandwidth-bound pass.
        tm2, tn2, tk2 = _choose_tiles(n_pad, n_pad, f_out_pad,
                                      adj_p.dtype.itemsize,
                                      support.dtype.itemsize, out_isz, budget)
        out_p = _tiled_matmul(adj_p, support, tm=tm2, tn=tn2, tk=tk2,
                              compute_dtype=cdt, out_dtype=out_dtype,
                              bias=bias_p, vmem_limit=vmem_limit)

    out = out_p[:n, :f_out]
    if bias is not None:
        # torch broadcasting: [N, F_out] + [1, 1, F_out] -> [1, N, F_out]
        return out.reshape(1, n, f_out)
    return out


def init_params(key, in_features, out_features, bias=False):
    """Deterministic re-implementation of GraphConvolution.reset_parameters()."""
    stdv = 1.0 / math.sqrt(out_features)
    kw, kb = jax.random.split(key)
    weight = jax.random.uniform(
        kw, (in_features, out_features), dtype=jnp.float32,
        minval=-stdv, maxval=stdv)
    b = None
    if bias:
        b = jax.random.uniform(
            kb, (1, 1, out_features), dtype=jnp.float32,
            minval=-stdv, maxval=stdv)
    return weight, b


if __name__ == "__main__":
    key = jax.random.PRNGKey(0)
    keys = jax.random.split(key, 10)

    # --- Small shapes consistent with the module (ML-GCN label graph) --------
    N, F_IN, F_OUT = 8, 32, 16
    x = jax.random.normal(keys[0], (N, F_IN), dtype=jnp.float32)
    adj_raw = jax.random.uniform(keys[1], (N, N), dtype=jnp.float32)
    adj = adj_raw / jnp.sum(adj_raw, axis=1, keepdims=True)
    weight, _ = init_params(keys[2], F_IN, F_OUT, bias=False)
    ref = adj @ (x @ weight)

    out = jax.block_until_ready(graph_convolution(x, adj, weight))  # bf16 MXU
    assert out.shape == (N, F_OUT)
    assert jnp.allclose(out, ref, atol=2e-2, rtol=2e-2)

    out_f32 = jax.block_until_ready(
        graph_convolution(x, adj, weight, compute_dtype=jnp.float32))
    assert jnp.allclose(out_f32, ref, atol=1e-5, rtol=1e-5)

    # bias=True path: bias [1,1,F_out], torch broadcast -> [1, N, F_out]
    weight_b, bias_b = init_params(keys[2], F_IN, F_OUT, bias=True)
    ref_b = (adj @ (x @ weight_b)) + bias_b
    out_b = jax.block_until_ready(
        graph_convolution(x, adj, weight_b, bias=bias_b,
                          compute_dtype=jnp.float32))
    assert out_b.shape == (1, N, F_OUT)
    assert jnp.allclose(out_b, ref_b, atol=1e-5, rtol=1e-5)

    # --- Medium shapes: fused single-kernel path (n_pad = 640 fits VMEM) -----
    N2, F_IN2, F_OUT2 = 600, 300, 80
    x2 = jax.random.normal(keys[3], (N2, F_IN2), dtype=jnp.float32)
    adj2_raw = jax.random.uniform(keys[4], (N2, N2), dtype=jnp.float32)
    adj2 = adj2_raw / jnp.sum(adj2_raw, axis=1, keepdims=True)
    weight2, bias2 = init_params(keys[5], F_IN2, F_OUT2, bias=True)
    ref2 = (np.asarray(adj2, np.float64)
            @ (np.asarray(x2, np.float64) @ np.asarray(weight2, np.float64))
            + np.asarray(bias2, np.float64))

    out2 = jax.block_until_ready(
        graph_convolution(x2, adj2, weight2, bias=bias2,
                          compute_dtype=jnp.float32))
    assert out2.shape == (1, N2, F_OUT2)
    assert np.allclose(np.asarray(out2, np.float64), ref2, atol=5e-3, rtol=5e-3)

    out2_bf16 = jax.block_until_ready(
        graph_convolution(x2, adj2, weight2, bias=bias2))
    assert out2_bf16.shape == (1, N2, F_OUT2)
    assert np.allclose(np.asarray(out2_bf16, np.float64), ref2,
                       atol=3e-2, rtol=3e-2)

    # --- Large shapes: exercises the two-pass tiled path (n_pad = 1536) ------
    N3, F_IN3, F_OUT3 = 1536, 256, 192
    x3 = jax.random.normal(keys[6], (N3, F_IN3), dtype=jnp.float32)
    adj3 = jax.random.uniform(keys[7], (N3, N3), dtype=jnp.float32)
    weight3, bias3 = init_params(keys[8], F_IN3, F_OUT3, bias=True)
    ref3 = (np.asarray(adj3, np.float64)
            @ (np.asarray(x3, np.float64) @ np.asarray(weight3, np.float64))
            + np.asarray(bias3, np.float64))

    out3_f32 = jax.block_until_ready(
        graph_convolution(x3, adj3, weight3, bias=bias3,
                          compute_dtype=jnp.float32))
    assert out3_f32.shape == (1, N3, F_OUT3)
    assert np.allclose(np.asarray(out3_f32, np.float64), ref3,
                       atol=5e-2, rtol=5e-3)

    out3 = jax.block_until_ready(
        graph_convolution(x3, adj3, weight3, bias=bias3))  # bf16 MXU default
    assert out3.shape == (1, N3, F_OUT3)
    assert np.allclose(np.asarray(out3, np.float64), ref3, atol=5e-1, rtol=3e-2)

    # --- Direct test of the streamed multi-K accumulator kernels -------------
    A = jax.random.normal(keys[9], (256, 512), dtype=jnp.float32)
    B = jax.random.normal(keys[0], (512, 256), dtype=jnp.float32)
    bias_m = jax.random.normal(keys[1], (1, 256), dtype=jnp.float32)
    ref_m = np.asarray(A, np.float64) @ np.asarray(B, np.float64)

    C = jax.block_until_ready(
        _tiled_matmul(A, B, tm=128, tn=128, tk=128,
                      compute_dtype=jnp.dtype(jnp.float32),
                      out_dtype=jnp.float32, vmem_limit=_vmem_limit_bytes()))
    assert np.allclose(np.asarray(C, np.float64), ref_m, atol=1e-3, rtol=1e-3)

    Cb = jax.block_until_ready(
        _tiled_matmul(A, B, tm=128, tn=128, tk=128,
                      compute_dtype=jnp.dtype(jnp.float32),
                      out_dtype=jnp.float32, bias=bias_m,
                      vmem_limit=_vmem_limit_bytes()))
    assert np.allclose(np.asarray(Cb, np.float64),
                       ref_m + np.asarray(bias_m, np.float64),
                       atol=1e-3, rtol=1e-3)

    print("KERNEL_OK")
</pallas_src>

<mosaic_0001>
module attributes {stable_mosaic.version = 11 : i64} {
  func.func @_fused_gcn_kernel(%arg0: i32, %arg1: memref<128x128xbf16, #tpu.memory_space<vmem>>, %arg2: memref<128x128xbf16, #tpu.memory_space<vmem>>, %arg3: memref<128x128xbf16, #tpu.memory_space<vmem>>, %arg4: memref<128x128xf32, #tpu.memory_space<vmem>>) attributes {dimension_semantics = [#tpu.dimension_semantics<arbitrary>], iteration_bounds = array<i64: 1>, scalar_prefetch = 0 : i64, scratch_operands = 0 : i64, tpu.core_type = #tpu.core_type<tc>, window_params = [{pipeline_mode = #tpu.pipeline_mode<synchronous>, transform_indices = @transform_0, window_bounds = array<i64: 128, 128>}, {pipeline_mode = #tpu.pipeline_mode<synchronous>, transform_indices = @transform_1, window_bounds = array<i64: 128, 128>}, {pipeline_mode = #tpu.pipeline_mode<synchronous>, transform_indices = @transform_2, window_bounds = array<i64: 128, 128>}, {pipeline_mode = #tpu.pipeline_mode<synchronous>, transform_indices = @transform_3, window_bounds = array<i64: 128, 128>}]} {
    %c0 = arith.constant 0 : index
    %c0_0 = arith.constant 0 : index
    %0 = vector.load %arg1[%c0, %c0_0] : memref<128x128xbf16, #tpu.memory_space<vmem>>, vector<128x128xbf16>
    %c0_1 = arith.constant 0 : index
    %c0_2 = arith.constant 0 : index
    %1 = vector.load %arg2[%c0_1, %c0_2] : memref<128x128xbf16, #tpu.memory_space<vmem>>, vector<128x128xbf16>
    %cst = arith.constant dense<0.000000e+00> : vector<128x128xf32>
    %2 = tpu.matmul %0, %1, %cst {dimension_numbers = #tpu.dot_dimension_numbers<[1], [0], [0], [1], [0, 0, 1, 1], [], []>} : vector<128x128xbf16>, vector<128x128xbf16>, vector<128x128xf32> -> vector<128x128xf32>
    %c0_3 = arith.constant 0 : index
    %c0_4 = arith.constant 0 : index
    %3 = vector.load %arg3[%c0_3, %c0_4] : memref<128x128xbf16, #tpu.memory_space<vmem>>, vector<128x128xbf16>
    %4 = arith.truncf %2 : vector<128x128xf32> to vector<128x128xbf16>
    %cst_5 = arith.constant dense<0.000000e+00> : vector<128x128xf32>
    %5 = tpu.matmul %3, %4, %cst_5 {dimension_numbers = #tpu.dot_dimension_numbers<[1], [0], [0], [1], [0, 0, 1, 1], [], []>} : vector<128x128xbf16>, vector<128x128xbf16>, vector<128x128xf32> -> vector<128x128xf32>
    %c0_6 = arith.constant 0 : index
    %c0_7 = arith.constant 0 : index
    %6 = vector.load %arg4[%c0_6, %c0_7] : memref<128x128xf32, #tpu.memory_space<vmem>>, vector<128x128xf32>
    tpu.vector_store %arg4[%c0_6, %c0_7], %5 {strides = array<i32>} : memref<128x128xf32, #tpu.memory_space<vmem>>, vector<128x128xf32>,
    return
  }
  func.func @transform_0(%arg0: i32) -> (i32, i32) {
    %c0_i32 = arith.constant 0 : i32
    %c0_i32_0 = arith.constant 0 : i32
    %c0_i32_1 = arith.constant 0 : i32
    return %c0_i32, %c0_i32_0 : i32, i32
  }
  func.func @transform_1(%arg0: i32) -> (i32, i32) {
    %c0_i32 = arith.constant 0 : i32
    %c0_i32_0 = arith.constant 0 : i32
    %c0_i32_1 = arith.constant 0 : i32
    return %c0_i32, %c0_i32_0 : i32, i32
  }
  func.func @transform_2(%arg0: i32) -> (i32, i32) {
    %c0_i32 = arith.constant 0 : i32
    %c0_i32_0 = arith.constant 0 : i32
    %c0_i32_1 = arith.constant 0 : i32
    return %c0_i32, %c0_i32_0 : i32, i32
  }
  func.func @transform_3(%arg0: i32) -> (i32, i32) {
    %c0_i32 = arith.constant 0 : i32
    %c0_i32_0 = arith.constant 0 : i32
    %c0_i32_1 = arith.constant 0 : i32
    return %c0_i32, %c0_i32_0 : i32, i32
  }
}

</mosaic_0001>

<bundles_post_ra>
// kernel: graph_convolution.1
= control target key start
LH: loop header
LB: loop body
LE: loop exit
PB: predicated region body
PF: predicated region fallthrough
CT: control target
= control target key end

     0   :  { %s713_s1 = inlined_call_operand.vmem [shape: bf16[128,128], index: 1, kind: input, shape index: {}]   ;;  %s714_s0 = inlined_call_operand.vmem [shape: bf16[128,128], index: 0, kind: input, shape index: {}]   ;;  %s715_s2 = inlined_call_operand.vmem [shape: bf16[128,128], index: 2, kind: input, shape index: {}]   ;;  %s716_s3 = inlined_call_operand.vmem [shape: f32[128,128], index: 3, kind: output, shape index: {}]  }
   0x1   :  { %v549_v0 = vld [vmem:[%s713_s1 + $0x38] sm:$0xff]   ;;  %v550_v1 = vld [vmem:[%s713_s1 + $0x30] sm:$0xff]   ;;  %v551_v2 = vld [vmem:[%s713_s1 + $0x28] sm:$0xff]  }
   0x2   :  { %485 = vmatprep.subr.bf16.mxu0 %v549_v0  ;;  %v552_v3 = vld [vmem:[%s713_s1 + $0x20] sm:$0xff]   ;;  %v553_v5 = vld [vmem:[%s713_s1 + $0x18] sm:$0xff]   ;;  %v554_v6 = vld [vmem:[%s713_s1 + $0x10] sm:$0xff]  }
   0x3   :  { %486 = vmatpush3.bf16.msra.mxu0 %v549_v0  ;;  %v557_v4 = vld [vmem:[%s714_s0] sm:$0xff]   ;;  %v555_v7 = vld [vmem:[%s713_s1 + $0x8] sm:$0xff]   ;;  %v559_v10 = vld [vmem:[%s714_s0 + $0x10] sm:$0xff]  }
   0x4   :  { %487 = vmatprep.subr.bf16.mxu0 %v550_v1  ;;  %501 = vmatprep.mubr.bf16.mxu0 %v557_v4  ;;  %v556_v8 = vld [vmem:[%s713_s1] sm:$0xff]   ;;  %v558_v9 = vld [vmem:[%s714_s0 + $0x8] sm:$0xff]   ;;  %v560_v11 = vld [vmem:[%s714_s0 + $0x18] sm:$0xff]  }
   0x5   :  { %v561_v12 = vld [vmem:[%s714_s0 + $0x20] sm:$0xff]   ;;  %v562_v13 = vld [vmem:[%s714_s0 + $0x28] sm:$0xff]   ;;  %v563_v14 = vld [vmem:[%s714_s0 + $0x30] sm:$0xff]  }
   0x6   :  { %v564_v15 = vld [vmem:[%s714_s0 + $0x38] sm:$0xff]   ;;  %v565_v16 = vld [vmem:[%s715_s2] sm:$0xff]   ;;  %v566_v41 = vld [vmem:[%s715_s2 + $0x8] sm:$0xff]  }
   0x7   :  { %488 = vmatpush3.bf16.msra.mxu0 %v550_v1  ;;  %533 = vmatprep.mubr.bf16.mxu1 %v565_v16  ;;  %v567_v42 = vld [vmem:[%s715_s2 + $0x10] sm:$0xff]   ;;  %v568_v43 = vld [vmem:[%s715_s2 + $0x18] sm:$0xff]   ;;  %v569_v44 = vld [vmem:[%s715_s2 + $0x20] sm:$0xff]  }
   0x8   :  { %489 = vmatprep.subr.bf16.mxu0 %v551_v2  ;;  %v570_v45 = vld [vmem:[%s715_s2 + $0x28] sm:$0xff]   ;;  %v571_v46 = vld [vmem:[%s715_s2 + $0x30] sm:$0xff]   ;;  %v572_v47 = vld [vmem:[%s715_s2 + $0x38] sm:$0xff]  }
   0xb   :  { %490 = vmatpush3.bf16.msra.mxu0 %v551_v2 }
   0xc   :  { %491 = vmatprep.subr.bf16.mxu0 %v552_v3 }
   0xf   :  { %492 = vmatpush3.bf16.msra.mxu0 %v552_v3 }
  0x10   :  { %493 = vmatprep.subr.bf16.mxu0 %v553_v5 }
  0x13   :  { %494 = vmatpush3.bf16.msra.mxu0 %v553_v5 }
  0x14   :  { %495 = vmatprep.subr.bf16.mxu0 %v554_v6 }
  0x17   :  { %496 = vmatpush3.bf16.msra.mxu0 %v554_v6 }
  0x18   :  { %497 = vmatprep.subr.bf16.mxu0 %v555_v7 }
  0x1b   :  { %498 = vmatpush3.bf16.msra.mxu0 %v555_v7 }
  0x1c   :  { %499 = vmatprep.subr.bf16.mxu0 %v556_v8 }
  0x1f   :  { %500 = vmatpush3.bf16.msra.mxu0 %v556_v8 }
  0x22   :  { %502 = vmatmul.mubr.bf16.vlgmr.msra.gmra.mxu0 %v558_v9 }
  0x23   :  { %505 = vmatprep.mubr.bf16.mxu0 %v559_v10 }
  0x2a   :  { %506 = vmatmul.mubr.bf16.gmra.mxu0 %v560_v11 }
  0x2b   :  { %509 = vmatprep.mubr.bf16.mxu0 %v561_v12 }
  0x32   :  { %510 = vmatmul.mubr.bf16.gmra.mxu0 %v562_v13 }
  0x33   :  { %513 = vmatprep.mubr.bf16.mxu0 %v563_v14 }
  0x3a   :  { %514 = vmatmul.mubr.bf16.gmra.mxu0 %v564_v15 }
  0xe2   :  { %v503_v17 = vpop.f32.mrf.mxu0 }
  0xe4   :  { %v177_v18 = vpop.f32.mrf.mxu0 }
  0xe6   :  { %v504_v19 = vpop.f32.mrf.mxu0 }
  0xe7   :  { %v257_v39 = vpack.c.bf16 %v504_v19, %v503_v17 }
  0xe8   :  { %v180_v20 = vpop.f32.mrf.mxu0 }
  0xe9   :  { %v256_v40 = vpack.c.bf16 %v180_v20, %v177_v18 }
  0xea   :  { %v507_v21 = vpop.f32.mrf.mxu0 }
  0xec   :  { %v193_v22 = vpop.f32.mrf.mxu0 }
  0xee   :  { %v508_v23 = vpop.f32.mrf.mxu0 }
  0xef   :  { %v259_v37 = vpack.c.bf16 %v508_v23, %v507_v21 }
  0xf0   :  { %v196_v24 = vpop.f32.mrf.mxu0 }
  0xf1   :  { %v258_v38 = vpack.c.bf16 %v196_v24, %v193_v22 }
  0xf2   :  { %v511_v25 = vpop.f32.mrf.mxu0 }
  0xf4   :  { %v209_v26 = vpop.f32.mrf.mxu0 }
  0xf6   :  { %v512_v27 = vpop.f32.mrf.mxu0 }
  0xf7   :  { %v261_v35 = vpack.c.bf16 %v512_v27, %v511_v25 }
  0xf8   :  { %v212_v28 = vpop.f32.mrf.mxu0 }
  0xf9   :  { %v260_v36 = vpack.c.bf16 %v212_v28, %v209_v26 }
  0xfa   :  { %v515_v29 = vpop.f32.mrf.mxu0 }
  0xfc   :  { %v225_v30 = vpop.f32.mrf.mxu0 }
  0xfe   :  { %v516_v31 = vpop.f32.mrf.mxu0 }
  0xff   :  { %v263_v32 = vpack.c.bf16 %v516_v31, %v515_v29 }
 0x100   :  { %v228_v33 = vpop.f32.mrf.mxu0 }
 0x101   :  { %v262_v34 = vpack.c.bf16 %v228_v33, %v225_v30  ;;  %517 = vmatprep.subr.bf16.mxu1 %v263_v32 }
 0x102   :  { %518 = vmatpush3.bf16.msra.mxu1 %v263_v32 }
 0x103   :  { %519 = vmatprep.subr.bf16.mxu1 %v262_v34 }
 0x106   :  { %520 = vmatpush3.bf16.msra.mxu1 %v262_v34 }
 0x107   :  { %521 = vmatprep.subr.bf16.mxu1 %v261_v35 }
 0x10a   :  { %522 = vmatpush3.bf16.msra.mxu1 %v261_v35 }
 0x10b   :  { %523 = vmatprep.subr.bf16.mxu1 %v260_v36 }
 0x10e   :  { %524 = vmatpush3.bf16.msra.mxu1 %v260_v36 }
 0x10f   :  { %525 = vmatprep.subr.bf16.mxu1 %v259_v37 }
 0x112   :  { %526 = vmatpush3.bf16.msra.mxu1 %v259_v37 }
 0x113   :  { %527 = vmatprep.subr.bf16.mxu1 %v258_v38 }
 0x116   :  { %528 = vmatpush3.bf16.msra.mxu1 %v258_v38 }
 0x117   :  { %529 = vmatprep.subr.bf16.mxu1 %v257_v39 }
 0x11a   :  { %530 = vmatpush3.bf16.msra.mxu1 %v257_v39 }
 0x11b   :  { %531 = vmatprep.subr.bf16.mxu1 %v256_v40 }
 0x11e   :  { %532 = vmatpush3.bf16.msra.mxu1 %v256_v40 }
 0x121   :  { %534 = vmatmul.mubr.bf16.vlgmr.msra.gmra.mxu1 %v566_v41 }
 0x122   :  { %537 = vmatprep.mubr.bf16.mxu1 %v567_v42 }
 0x129   :  { %538 = vmatmul.mubr.bf16.gmra.mxu1 %v568_v43 }
 0x12a   :  { %541 = vmatprep.mubr.bf16.mxu1 %v569_v44 }
 0x131   :  { %542 = vmatmul.mubr.bf16.gmra.mxu1 %v570_v45 }
 0x132   :  { %545 = vmatprep.mubr.bf16.mxu1 %v571_v46 }
 0x139   :  { %546 = vmatmul.mubr.bf16.gmra.mxu1 %v572_v47 }
 0x1e1   :  { %v535_v48 = vpop.f32.mrf.mxu1 }
 0x1e2   :  { %411 = vst [vmem:[%s716_s3 + $0x10] sm:$0xff] %v535_v48 }
 0x1e3   :  { %v346_v49 = vpop.f32.mrf.mxu1 }
 0x1e4   :  { %409 = vst [vmem:[%s716_s3] sm:$0xff] %v346_v49 }
 0x1e5   :  { %v536_v50 = vpop.f32.mrf.mxu1 }
 0x1e6   :  { %412 = vst [vmem:[%s716_s3 + $0x18] sm:$0xff] %v536_v50 }
 0x1e7   :  { %v349_v51 = vpop.f32.mrf.mxu1 }
 0x1e8   :  { %410 = vst [vmem:[%s716_s3 + $0x8] sm:$0xff] %v349_v51 }
 0x1e9   :  { %v539_v52 = vpop.f32.mrf.mxu1 }
 0x1ea   :  { %415 = vst [vmem:[%s716_s3 + $0x30] sm:$0xff] %v539_v52 }
 0x1eb   :  { %v362_v53 = vpop.f32.mrf.mxu1 }
 0x1ec   :  { %413 = vst [vmem:[%s716_s3 + $0x20] sm:$0xff] %v362_v53 }
 0x1ed   :  { %v540_v54 = vpop.f32.mrf.mxu1 }
 0x1ee   :  { %416 = vst [vmem:[%s716_s3 + $0x38] sm:$0xff] %v540_v54 }
 0x1ef   :  { %v365_v55 = vpop.f32.mrf.mxu1 }
 0x1f0   :  { %414 = vst [vmem:[%s716_s3 + $0x28] sm:$0xff] %v365_v55 }
 0x1f1   :  { %v543_v56 = vpop.f32.mrf.mxu1 }
 0x1f2   :  { %419 = vst [vmem:[%s716_s3 + $0x50] sm:$0xff] %v543_v56 }
 0x1f3   :  { %v378_v57 = vpop.f32.mrf.mxu1 }
 0x1f4   :  { %417 = vst [vmem:[%s716_s3 + $0x40] sm:$0xff] %v378_v57 }
 0x1f5   :  { %v544_v58 = vpop.f32.mrf.mxu1 }
 0x1f6   :  { %420 = vst [vmem:[%s716_s3 + $0x58] sm:$0xff] %v544_v58 }
 0x1f7   :  { %v381_v59 = vpop.f32.mrf.mxu1 }
 0x1f8   :  { %418 = vst [vmem:[%s716_s3 + $0x48] sm:$0xff] %v381_v59 }
 0x1f9   :  { %v547_v60 = vpop.f32.mrf.mxu1 }
 0x1fa   :  { %423 = vst [vmem:[%s716_s3 + $0x70] sm:$0xff] %v547_v60 }
 0x1fb   :  { %v394_v61 = vpop.f32.mrf.mxu1 }
 0x1fc   :  { %421 = vst [vmem:[%s716_s3 + $0x60] sm:$0xff] %v394_v61 }
 0x1fd   :  { %v548_v62 = vpop.f32.mrf.mxu1 }
 0x1fe   :  { %424 = vst [vmem:[%s716_s3 + $0x78] sm:$0xff] %v548_v62 }
 0x1ff   :  { %v397_v63 = vpop.f32.mrf.mxu1 }
 0x200   :  { %422 = vst [vmem:[%s716_s3 + $0x68] sm:$0xff] %v397_v63 }

</bundles_post_ra>
